<compile_context>
chip_gen: v5e
topology: v5e:2x2
jax: 0.10.0
libtpu: 0.0.40
codegen_flags: <defaults>
</compile_context>

<pallas_src>
import jax
import jax.numpy as jnp
from jax.experimental import pallas as pl
from jax.experimental.pallas import tpu as pltpu


def _round_up(v, m):
    return ((v + m - 1) // m) * m


def _weight_spec(shape):
    """Constant-index weight BlockSpec, single-buffered when supported."""
    try:
        return pl.BlockSpec(shape, lambda i: (0, 0), pipeline_mode=pl.Buffered(1))
    except TypeError:  # older/newer API without pipeline_mode kwarg
        return pl.BlockSpec(shape, lambda i: (0, 0))


def _vmem_capacity_bytes():
    """Per-core VMEM capacity (64 MiB on v7x, 128 MiB on v5e/v6e)."""
    try:
        return int(pltpu.get_tpu_info().vmem_capacity_bytes)
    except Exception:
        return 64 << 20  # conservative fallback (v7x value)


def dim_reduction(x, w1, res_weights=(), *, block_n=1024, out_dtype=jnp.float32):
    """DimReduction forward.

    Args:
      x:   (N, C) activations. Contract: the producer should already emit bf16;
           an f32 x doubles the dominant HBM->VMEM DMA stream (no wrapper cast
           is added here on purpose -- fix it upstream).
      w1:  (C, M) fc1 weight, already transposed vs PyTorch's (M, C).
      res_weights: sequence of (wa, wb) pairs, each (M, M) transposed weights
        for one residual block (numLayer_Res == len(res_weights)).
      block_n: instance-tile size (rows of x per grid step). Guidance:
        v5e: 512-1024 (MXU-bound; bigger tiles buy nothing).
        v6e: 1024-4096 (128 MiB VMEM).
        v7x: <= 2048 (<= 1024 for C >= 2048) -- 64 MiB per-core VMEM.
        The wrapper additionally caps block_n so the grid has >= 2 steps
        (megacore sharding on v7x) and clamps to the VMEM budget.
      out_dtype: jnp.float32 (PyTorch-matching) or jnp.bfloat16 (halves HBM
        writeback; use when the downstream attention accepts bf16).

    Returns:
      (N, M) activations in out_dtype.
    """
    n, c = x.shape
    cw, m = w1.shape
    assert cw == c, "w1 must be (n_channels, m_dim) (transposed vs PyTorch)"
    assert m % 128 == 0, "m_dim should be a multiple of 128 for lane-dense output"
    num_res = len(res_weights)

    # Force bf16 MXU operands (static one-time weight cast; f32 accumulate in-kernel).
    compute_dtype = jnp.bfloat16
    w1 = w1.astype(compute_dtype)
    flat_res = [w.astype(compute_dtype)
                for pair in res_weights for w in pair]  # wa0, wb0, wa1, wb1, ...
    for w in flat_res:
        assert w.shape == (m, m)

    # --- block_n selection -------------------------------------------------
    # Multiple of 128, and small enough that the grid has >= 2 steps so the
    # "parallel" axis shards across both TensorCores on v7x.
    half_n = _round_up(pl.cdiv(n, 2), 128)
    block_n = int(max(128, min(_round_up(block_n, 128), half_n)))

    x_item = jnp.dtype(x.dtype).itemsize
    out_item = jnp.dtype(out_dtype).itemsize
    w_item = jnp.dtype(compute_dtype).itemsize
    weight_bytes = (c * m + 2 * num_res * m * m) * w_item

    def _vmem_need(bn):
        return (2 * bn * c * x_item            # x tiles (double-buffered)
                + 2 * bn * m * out_item        # out tiles (double-buffered)
                + weight_bytes                 # weights, single-buffered
                + 3 * bn * m * 4               # in-kernel h/t f32 + bf16 copies
                + (4 << 20))                   # headroom

    vmem_cap = _vmem_capacity_bytes()
    vmem_ceiling = vmem_cap - (8 << 20)
    # Shrink block_n until the estimated footprint fits the physical VMEM.
    while block_n > 128 and _vmem_need(block_n) > vmem_ceiling:
        block_n = max(128, _round_up(block_n // 2, 128))
    vmem_bytes = int(min(vmem_ceiling, max(_vmem_need(block_n), 16 << 20)))

    grid = (pl.cdiv(n, block_n),)

    # --- kernel -------------------------------------------------------------
    def kernel(x_ref, w1_ref, *rest):
        res_refs = rest[:-1]
        o_ref = rest[-1]

        xd = x_ref[...]
        if xd.dtype != compute_dtype:
            xd = xd.astype(compute_dtype)  # no-op when the bf16 input contract holds
        # fc1 + ReLU (single MXU matmul, f32 accumulation).
        h = jnp.maximum(
            jnp.dot(xd, w1_ref[...], preferred_element_type=jnp.float32), 0.0)
        # Residual blocks: relu(relu(h @ Wa) @ Wb) added back to h.
        for r in range(num_res):
            wa = res_refs[2 * r][...]
            wb = res_refs[2 * r + 1][...]
            t = jnp.maximum(
                jnp.dot(h.astype(compute_dtype), wa,
                        preferred_element_type=jnp.float32), 0.0)
            t = jnp.maximum(
                jnp.dot(t.astype(compute_dtype), wb,
                        preferred_element_type=jnp.float32), 0.0)
            h = h + t
        o_ref[...] = h.astype(o_ref.dtype)

    # --- specs --------------------------------------------------------------
    in_specs = [pl.BlockSpec((block_n, c), lambda i: (i, 0)),
                _weight_spec((c, m))]
    in_specs += [_weight_spec((m, m)) for _ in flat_res]
    out_specs = pl.BlockSpec((block_n, m), lambda i: (i, 0))

    flops = 2 * n * c * m + num_res * 4 * n * m * m
    bytes_accessed = (n * c * x_item + n * m * out_item + weight_bytes)
    cost = pl.CostEstimate(flops=flops, transcendentals=0,
                           bytes_accessed=bytes_accessed)

    return pl.pallas_call(
        kernel,
        out_shape=jax.ShapeDtypeStruct((n, m), out_dtype),
        grid=grid,
        in_specs=in_specs,
        out_specs=out_specs,
        compiler_params=pltpu.CompilerParams(
            dimension_semantics=("parallel",),
            vmem_limit_bytes=vmem_bytes,
        ),
        cost_estimate=cost,
    )(x, w1, *flat_res)


def _init_linear_weight(key, fan_in, fan_out):
    """PyTorch Linear(bias=False) init, stored transposed as (fan_in, fan_out)."""
    bound = 1.0 / jnp.sqrt(jnp.float32(fan_in))
    return jax.random.uniform(key, (fan_in, fan_out), jnp.float32, -bound, bound)


if __name__ == "__main__":
    # Small, module-consistent shapes: N instances, C input channels,
    # M = m_dim, R = numLayer_Res residual blocks.
    N, C, M, R = 256, 256, 128, 1

    key = jax.random.PRNGKey(0)
    kx, k1, ka, kb = jax.random.split(key, 4)
    # Input contract: x arrives already in bf16 from the producing op.
    x = jax.random.normal(kx, (N, C), dtype=jnp.float32).astype(jnp.bfloat16)
    w1 = _init_linear_weight(k1, C, M)   # fc1 (wrapper casts to bf16 once)
    wa = _init_linear_weight(ka, M, M)   # residual block linear 1
    wb = _init_linear_weight(kb, M, M)   # residual block linear 2

    # block_n larger than N/2 -> wrapper clamps so the grid has 2 steps.
    out = dim_reduction(x, w1, res_weights=[(wa, wb)], block_n=1024)
    out = jax.block_until_ready(out)

    # numLayer_Res = 0 path (default DimReduction config), bf16-output mode.
    out0 = dim_reduction(x, w1, block_n=1024, out_dtype=jnp.bfloat16)
    out0 = jax.block_until_ready(out0)

    # Plain-JAX reference mirroring the kernel's bf16-operand / f32-accumulate math.
    f32 = jnp.float32
    bf16 = jnp.bfloat16
    w1b, wab, wbb = w1.astype(bf16), wa.astype(bf16), wb.astype(bf16)
    h = jnp.maximum(jnp.dot(x, w1b, preferred_element_type=f32), 0.0)
    t = jnp.maximum(jnp.dot(h.astype(bf16), wab, preferred_element_type=f32), 0.0)
    t = jnp.maximum(jnp.dot(t.astype(bf16), wbb, preferred_element_type=f32), 0.0)
    ref = h + t

    assert out.shape == (N, M) and out.dtype == jnp.float32
    assert out0.shape == (N, M) and out0.dtype == jnp.bfloat16
    assert jnp.allclose(out, ref, atol=1e-3, rtol=1e-3), \
        float(jnp.max(jnp.abs(out - ref)))
    assert jnp.allclose(out0.astype(f32), h, atol=1e-2, rtol=1e-2), \
        float(jnp.max(jnp.abs(out0.astype(f32) - h)))
    print("KERNEL_OK")
</pallas_src>

<mosaic_0001>
module attributes {stable_mosaic.version = 11 : i64} {
  func.func @kernel(%arg0: i32, %arg1: memref<128x256xbf16, #tpu.memory_space<vmem>>, %arg2: memref<256x128xbf16, #tpu.memory_space<vmem>>, %arg3: memref<128x128xbf16, #tpu.memory_space<vmem>>, %arg4: memref<128x128xbf16, #tpu.memory_space<vmem>>, %arg5: memref<128x128xf32, #tpu.memory_space<vmem>>) attributes {dimension_semantics = [#tpu.dimension_semantics<parallel>], iteration_bounds = array<i64: 2>, scalar_prefetch = 0 : i64, scratch_operands = 0 : i64, tpu.core_type = #tpu.core_type<tc>, window_params = [{transform_indices = @transform_0, window_bounds = array<i64: 128, 256>}, {pipeline_mode = #tpu.pipeline_mode<synchronous>, transform_indices = @transform_1, window_bounds = array<i64: 256, 128>}, {pipeline_mode = #tpu.pipeline_mode<synchronous>, transform_indices = @transform_2, window_bounds = array<i64: 128, 128>}, {pipeline_mode = #tpu.pipeline_mode<synchronous>, transform_indices = @transform_3, window_bounds = array<i64: 128, 128>}, {transform_indices = @transform_4, window_bounds = array<i64: 128, 128>}]} {
    %c0 = arith.constant 0 : index
    %c0_0 = arith.constant 0 : index
    %0 = vector.load %arg1[%c0, %c0_0] : memref<128x256xbf16, #tpu.memory_space<vmem>>, vector<128x256xbf16>
    %c0_1 = arith.constant 0 : index
    %c0_2 = arith.constant 0 : index
    %1 = vector.load %arg2[%c0_1, %c0_2] : memref<256x128xbf16, #tpu.memory_space<vmem>>, vector<256x128xbf16>
    %cst = arith.constant dense<0.000000e+00> : vector<128x128xf32>
    %2 = tpu.matmul %0, %1, %cst {dimension_numbers = #tpu.dot_dimension_numbers<[1], [0], [0], [1], [0, 0, 1, 1], [], []>} : vector<128x256xbf16>, vector<256x128xbf16>, vector<128x128xf32> -> vector<128x128xf32>
    %cst_3 = arith.constant 0.000000e+00 : f32
    %3 = vector.broadcast %cst_3 : f32 to vector<128x128xf32>
    %4 = arith.maximumf %2, %3 : vector<128x128xf32>
    %c0_4 = arith.constant 0 : index
    %c0_5 = arith.constant 0 : index
    %5 = vector.load %arg3[%c0_4, %c0_5] : memref<128x128xbf16, #tpu.memory_space<vmem>>, vector<128x128xbf16>
    %c0_6 = arith.constant 0 : index
    %c0_7 = arith.constant 0 : index
    %6 = vector.load %arg4[%c0_6, %c0_7] : memref<128x128xbf16, #tpu.memory_space<vmem>>, vector<128x128xbf16>
    %7 = arith.truncf %4 : vector<128x128xf32> to vector<128x128xbf16>
    %cst_8 = arith.constant dense<0.000000e+00> : vector<128x128xf32>
    %8 = tpu.matmul %7, %5, %cst_8 {dimension_numbers = #tpu.dot_dimension_numbers<[1], [0], [0], [1], [0, 0, 1, 1], [], []>} : vector<128x128xbf16>, vector<128x128xbf16>, vector<128x128xf32> -> vector<128x128xf32>
    %cst_9 = arith.constant 0.000000e+00 : f32
    %9 = vector.broadcast %cst_9 : f32 to vector<128x128xf32>
    %10 = arith.maximumf %8, %9 : vector<128x128xf32>
    %11 = arith.truncf %10 : vector<128x128xf32> to vector<128x128xbf16>
    %cst_10 = arith.constant dense<0.000000e+00> : vector<128x128xf32>
    %12 = tpu.matmul %11, %6, %cst_10 {dimension_numbers = #tpu.dot_dimension_numbers<[1], [0], [0], [1], [0, 0, 1, 1], [], []>} : vector<128x128xbf16>, vector<128x128xbf16>, vector<128x128xf32> -> vector<128x128xf32>
    %cst_11 = arith.constant 0.000000e+00 : f32
    %13 = vector.broadcast %cst_11 : f32 to vector<128x128xf32>
    %14 = arith.maximumf %12, %13 : vector<128x128xf32>
    %15 = arith.addf %4, %14 : vector<128x128xf32>
    %c0_12 = arith.constant 0 : index
    %c0_13 = arith.constant 0 : index
    %16 = vector.load %arg5[%c0_12, %c0_13] : memref<128x128xf32, #tpu.memory_space<vmem>>, vector<128x128xf32>
    tpu.vector_store %arg5[%c0_12, %c0_13], %15 {strides = array<i32>} : memref<128x128xf32, #tpu.memory_space<vmem>>, vector<128x128xf32>,
    return
  }
  func.func @transform_0(%arg0: i32) -> (i32, i32) {
    %c0_i32 = arith.constant 0 : i32
    %c0_i32_0 = arith.constant 0 : i32
    return %arg0, %c0_i32 : i32, i32
  }
  func.func @transform_1(%arg0: i32) -> (i32, i32) {
    %c0_i32 = arith.constant 0 : i32
    %c0_i32_0 = arith.constant 0 : i32
    %c0_i32_1 = arith.constant 0 : i32
    return %c0_i32, %c0_i32_0 : i32, i32
  }
  func.func @transform_2(%arg0: i32) -> (i32, i32) {
    %c0_i32 = arith.constant 0 : i32
    %c0_i32_0 = arith.constant 0 : i32
    %c0_i32_1 = arith.constant 0 : i32
    return %c0_i32, %c0_i32_0 : i32, i32
  }
  func.func @transform_3(%arg0: i32) -> (i32, i32) {
    %c0_i32 = arith.constant 0 : i32
    %c0_i32_0 = arith.constant 0 : i32
    %c0_i32_1 = arith.constant 0 : i32
    return %c0_i32, %c0_i32_0 : i32, i32
  }
  func.func @transform_4(%arg0: i32) -> (i32, i32) {
    %c0_i32 = arith.constant 0 : i32
    %c0_i32_0 = arith.constant 0 : i32
    return %arg0, %c0_i32 : i32, i32
  }
}

</mosaic_0001>

<bundles_post_ra>
// kernel: tpu_custom_call.1
= control target key start
LH: loop header
LB: loop body
LE: loop exit
PB: predicated region body
PF: predicated region fallthrough
CT: control target
= control target key end

     0   :  { %9 = vsyncpa [#allocation3], 0  ;;  %s1939_s0 = inlined_call_operand.hbm [shape: bf16[256,256], index: 0, kind: input, shape index: {}]   ;;  %s1940_s1 = inlined_call_operand.hbm [shape: bf16[256,128], index: 1, kind: input, shape index: {}]   ;;  %s1941_s2 = inlined_call_operand.hbm [shape: bf16[128,128], index: 2, kind: input, shape index: {}]   ;;  %s1942_s3 = inlined_call_operand.hbm [shape: bf16[128,128], index: 3, kind: input, shape index: {}]   ;;  %s1943_s4 = inlined_call_operand.hbm [shape: f32[256,128], index: 4, kind: output, shape index: {}]  }
   0x1   :  { %11 = vsyncpa [#allocation3 + $0x1], 0 }
   0x2   :  { %12 = vsyncpa [#allocation6], 0 }
   0x3   :  { %13 = vsyncpa [#allocation9], 0 }
   0x4   :  { %14 = vsyncpa [#allocation4], 0 }
   0x5   :  { %16 = vsyncpa [#allocation4 + $0x1], 0  ;;  %s1610_s15 = smov 0   ;;  %s1612_s16 = smov 0  }
   0x6   :  { %s1614_s17 = smov 0   ;;  %s1616_s18 = smov 0  }
   0x7 LB: > { %s1631_s19 = sadd.s32 4294967295, %s1574_s18   ;;  %s1033_s20 = sadd.s32 4294967294, %s1574_s18   ;;  %s1574_s18 = sphi %s1616_s18, %s1954_s18   ;;  %s1570_s17 = sphi %s1614_s17, %s1953_s17   ;;  %s1566_s16 = sphi %s1612_s16, %s1952_s16   ;;  %s1562_s15 = sphi %s1610_s15, %s1951_s15  }
   0x8   : > { %p42_p0 = scmp.ne.s32.totalorder %s1566_s16, %s1562_s15  ;;  %p43_p1 = scmp.eq.s32.totalorder %s1631_s19, 0 }
   0x9   : > { %p129_p2 = scmp.eq.s32.totalorder %s1631_s19, 1  ;;  %p135_p3 = scmp.eq.s32.totalorder %s1033_s20, 1 }
   0xa   : > { %p1640_p4 = por %p43_p1, %p42_p0  ;;  %p1034_p5 = scmp.ge.s32.totalorder %s1574_s18, 1 }
   0xb   : > { %p1645_p6 = por %p135_p3, %p42_p0  ;;  %p142_p7 = scmp.lt.s32.totalorder %s1574_s18, 3 }
   0xc   : > { %s153_s25 = sshll.u32 %s1940_s1, 4  ;;  %s1576_s27 = smov [#allocation5]   ;;  %s154_s25 = int_to_ptr.hbm [resolvable:$true] %s153_s25 }
   0xd   : > { %p1653_p8 = pnand %p1034_p5, %p142_p7  ;;  %s155_s28 = sshll.u32 %s1576_s27, 4  ;;  %s156_s28 = int_to_ptr.vmem [resolvable:$true] %s155_s28 }
   0xe   : > { %s167_s6 = sshll.u32 %s1941_s2, 4  ;;  %s1577_s7 = smov 64   ;;  %s168_s6 = int_to_ptr.hbm [resolvable:$true] %s167_s6 }
   0xf   : > { %p1313_p9 = pneg %p1653_p8  ;;  %s1578_s8 = smov 4  }
  0x10   : > { %s1579_s9 = smov [#allocation7]   ;;  %s181_s13 = sshll.u32 %s1942_s3, 4  ;;  %s182_s13 = int_to_ptr.hbm [resolvable:$true] %s181_s13 }
  0x11   : > { %p1661_p10 = pnand %p1313_p9, %p43_p1  ;;  %s169_s10 = sshll.u32 %s1579_s9, 4  ;;  %s170_s10 = int_to_ptr.vmem [resolvable:$true] %s169_s10 }
  0x12   : > { %s1580_s14 = smov [#allocation8]   ;;  %s1677_s23 = sadd.s32 1, %s1574_s18  }
  0x13   : > { %1316 = dma.hbm_to_vmem [thread:$0]  (!%p1661_p10), %s154_s25, 2048, %s156_s28, [#allocation6], %s1577_s7, %s1577_s7, %s1578_s8  }
  0x14   : > { %1319 = dma.hbm_to_vmem [thread:$0]  (!%p1661_p10), %s168_s6, 1024, %s170_s10, [#allocation6], %s1577_s7, %s1577_s7, %s1578_s8  }
  0x15   : > { %s183_s20 = sshll.u32 %s1580_s14, 4  ;;  %s26_s24 = ssub.s32 %s1574_s18, %s1677_s23  ;;  %s184_s20 = int_to_ptr.vmem [resolvable:$true] %s183_s20 }
  0x16   : > { %1322 = dma.hbm_to_vmem [thread:$0]  (!%p1661_p10), %s182_s13, 1024, %s184_s20, [#allocation9], %s1577_s7, %s1577_s7, %s1578_s8  }
  0x17   : > { %s29_s25 = sadd.s32 1, %s1570_s17  ;;  %p27_p12 = scmp.eq.s32.totalorder %s26_s24, 0 }
  0x18   : > { %p36_p13 = scmp.ne.s32.totalorder %s1570_s17, %s1566_s16  ;;  %p37_p0 = scmp.eq.s32.totalorder %s1574_s18, 0 }
  0x19   : > { %p1334_p3 = scmp.lt.s32.totalorder %s1574_s18, 2  ;;  %s197_s30 = sand.u32 1, %s1570_s17  }
  0x1a   : > { %s1689_s27 = scalar_select %p27_p12, %s1570_s17, %s29_s25  }
  0x1b   : > { %p38_p5 = por %p37_p0, %p36_p13  ;;  %p1693_p7 = por %p129_p2, %p36_p13 }
  0x1c   : > { %s1247_s5 = sshll.u32 %s1574_s18, 7  ;;  %s1039_s29 = sshll.u32 %s197_s30, 7 }
  0x1d   : > { %s207_s8 = scalar_lea.hbm %s1939_s0, %s1247_s5  ;;  %s201_s10 = scalar_lea.vmem [#allocation2], %s1039_s29 }
  0x1e   : > { %s208_s9 = sshll.u32 %s207_s8, 4  ;;  %s210_s11 = sshll.u32 %s201_s10, 4  ;;  %s209_s9 = int_to_ptr.hbm [resolvable:$true] %s208_s9  ;;  %s211_s11 = int_to_ptr.vmem [resolvable:$true] %s210_s11 }
  0x1f   : > { %p1704_p9 = pnand %p1334_p3, %p38_p5  ;;  %s198_s13 = scalar_lea.sflag [#allocation3], %s197_s30 }
  0x20   : > { %s1470_s14 = sshra.s32 %s209_s9, 4  ;;  %s1477_s5 = scalar_lea.hbm %s1939_s0, 256  ;;  %s1471_s14 = int_to_ptr.hbm [resolvable:$true] %s1470_s14 }
  0x21   : > { %s1472_s20 = scalar_lea.hbm %s1471_s14, 128  ;;  %p1474_p10 = pneg %p1704_p9 }
  0x22   : > { %p1473_p2 = scmp.ne.s32.totalorder %s1471_s14, %s1472_s20  ;;  %p1478_p0 = scmp.lt.s32.totalorder %s1471_s14, %s1939_s0 }
  0x23   : > { %p1479_p3 = scmp.lt.s32.totalorder %s1477_s5, %s1472_s20 }
  0x24   : > { %p1475_p12 = pnand %p1474_p10, %p1473_p2 }
  0x25   : > { %p1480_p5 = por %p1479_p3, %p1478_p0 }
  0x26   : > { %p1476_p13 = pneg %p1475_p12 }
  0x28   : > { %p1481_p11 = pnand %p1480_p5, %p1476_p13 }
  0x2a   : > { %1484 = shalt.err (!%p1481_p11)
}
  0x2b   : > { %s1581_s30 = smov 128   ;;  %s1582_s7 = smov 8  }
  0x2c   : > { %1326 = dma.hbm_to_vmem [thread:$0]  (!%p1704_p9), %s209_s9, 2048, %s211_s11, %s198_s13, %s1581_s30, %s1581_s30, %s1582_s7  }
  0x2d   : > { %222 = sbr.rel (%p1653_p8) target bundleno = 632 (0x278), region = 36  ;;  %s1721_s8 = sand.u32 (!%p1653_p8), 1, %s1566_s16  }
  0x2e   : > { %s1044_s10 = sshll.u32 (!%p1653_p8), %s1721_s8, 7  ;;  %s225_s14 = scalar_lea.sflag (!%p1653_p8), [#allocation3], %s1721_s8 }
  0x2f   : > { %s1727_s20 = scalar_lea.vmem (!%p1653_p8), [#allocation2], %s1044_s10 }
  0x32   : > { %1545 = dma.done.wait (%p1640_p4), %s225_s14, 2048  }
  0x33   : > { %1547 = vsyncadd (%p1640_p4), %s225_s14, 4294965248 }
  0x34   : > { %1549 = dma.done.wait (%p43_p1), [#allocation6], 3072  }
  0x35   : > { %1551 = vsyncadd (%p43_p1), [#allocation6], 4294964224 }
  0x36   : > { %1553 = dma.done.wait (%p43_p1), [#allocation9], 1024  }
  0x37   : > { %1555 = vsyncadd (%p43_p1), [#allocation9], 4294966272  ;;  %v1271_v0 = vld [vmem:[#allocation5 + $0x38] sm:$0xff]  ;;  %v1270_v2 = vld [vmem:[#allocation5 + $0x30] sm:$0xff]  ;;  %s1857_s21 = scalar_lea.vmem [#allocation10], %s1044_s10  ;;  %s1296_s26 = sshll.u32 %s1631_s19, 7 }
  0x38   : > { %v1279_v1 = vld [vmem:[#allocation5 + $0x78] sm:$0xff]  ;;  %495 = vmatpush.bf16.msra.mxu0 %v1271_v0  ;;  %v1278_v3 = vld [vmem:[#allocation5 + $0x70] sm:$0xff]  ;;  %v1269_v4 = vld [vmem:[#allocation5 + $0x28] sm:$0xff]  ;;  %s927_s12 = scalar_lea.hbm %s1943_s4, %s1296_s26  ;;  %s928_s13 = sshll.u32 %s1857_s21, 4  ;;  %s929_s13 = int_to_ptr.vmem [resolvable:$true] %s928_s13 }
  0x39   : > { %544 = vmatpush.bf16.msra.mxu1 %v1279_v1  ;;  %v1277_v5 = vld [vmem:[#allocation5 + $0x68] sm:$0xff]  ;;  %v1268_v6 = vld [vmem:[#allocation5 + $0x20] sm:$0xff]  ;;  %v1267_v8 = vld [vmem:[#allocation5 + $0x18] sm:$0xff]  ;;  %s930_s24 = sshll.u32 %s927_s12, 4  ;;  %s916_s19 = scalar_lea.sflag [#allocation4], %s1721_s8  ;;  %s931_s24 = int_to_ptr.hbm [resolvable:$true] %s930_s24 }
  0x3a   : > { %v1276_v7 = vld [vmem:[#allocation5 + $0x60] sm:$0xff]  ;;  %v1275_v9 = vld [vmem:[#allocation5 + $0x58] sm:$0xff]  ;;  %v1266_v10 = vld [vmem:[#allocation5 + $0x10] sm:$0xff]  ;;  %s1514_s25 = sshra.s32 %s931_s24, 4  ;;  %s1520_s30 = scalar_lea.hbm %s1943_s4, 256  ;;  %s1515_s25 = int_to_ptr.hbm [resolvable:$true] %s1514_s25 }
  0x3b   : > { %v1274_v11 = vld [vmem:[#allocation5 + $0x50] sm:$0xff]  ;;  %v1265_v12 = vld [vmem:[#allocation5 + $0x8] sm:$0xff]  ;;  %v1264_v14 = vld [vmem:[#allocation5] sm:$0xff]  ;;  %s1516_s5 = scalar_lea.hbm %s1515_s25, 128  ;;  %p1521_p11 = scmp.lt.s32.totalorder %s1515_s25, %s1943_s4 }
  0x3c   : > { %496 = vmatpush.bf16.msra.mxu0 %v1270_v2  ;;  %v1273_v13 = vld [vmem:[#allocation5 + $0x48] sm:$0xff]  ;;  %v1272_v15 = vld [vmem:[#allocation5 + $0x40] sm:$0xff]  ;;  %v1059_v22 = vld [vmem:[%s1727_s20 + $0x10] sm:$0xf]  ;;  %p1517_p1 = scmp.ne.s32.totalorder %s1515_s25, %s1516_s5  ;;  %p1522_p9 = scmp.lt.s32.totalorder %s1520_s30, %s1516_s5 }
  0x3d   : > { %545 = vmatpush.bf16.msra.mxu1 %v1278_v3  ;;  %v1051_v16 = vld [vmem:[%s1727_s20] sm:$0xf]  ;;  %v1249_v17 = vld [vmem:[%s1727_s20 + $0x4] sm:$0xf0]  ;;  %v1248_v18 = vld [vmem:[%s1727_s20 + $0x4] sm:$0xf] }
  0x3e   : > { %v1053_v19 = vld [vmem:[%s1727_s20 + $0x8] sm:$0xf0]  ;;  %v1052_v20 = vor.u32 %v1249_v17, %v1051_v16  ;;  %v1251_v23 = vld [vmem:[%s1727_s20 + $0x14] sm:$0xf0]  ;;  %v1250_v24 = vld [vmem:[%s1727_s20 + $0x14] sm:$0xf]  ;;  %p1518_p4 = pnand %p1517_p1, %p1693_p7  ;;  %p1523_p2 = por %p1522_p9, %p1521_p11 }
  0x3f   : > { %v1056_v21 = vor.u32 %v1248_v18, %v1053_v19  ;;  %v1061_v25 = vld [vmem:[%s1727_s20 + $0x18] sm:$0xf0]  ;;  %v1060_v26 = vor.u32 %v1251_v23, %v1059_v22  ;;  %v1067_v28 = vld [vmem:[%s1727_s20 + $0x20] sm:$0xf]  ;;  %v1253_v29 = vld [vmem:[%s1727_s20 + $0x24] sm:$0xf0] }
  0x40   : > { %497 = vmatpush.bf16.msra.mxu0 %v1269_v4  ;;  %v1064_v27 = vor.u32 %v1250_v24, %v1061_v25  ;;  %v1252_v30 = vld [vmem:[%s1727_s20 + $0x24] sm:$0xf]  ;;  %v1069_v31 = vld [vmem:[%s1727_s20 + $0x28] sm:$0xf0]  ;;  %v1068_v32 = vor.u32 %v1253_v29, %v1067_v28  ;;  %v1075_v34 = vld [vmem:[%s1727_s20 + $0x30] sm:$0xf]  ;;  %p1519_p8 = pneg %p1518_p4 }
  0x41   : > { %546 = vmatpush.bf16.msra.mxu1 %v1277_v5  ;;  %v1072_v33 = vor.u32 %v1252_v30, %v1069_v31  ;;  %v1255_v35 = vld [vmem:[%s1727_s20 + $0x34] sm:$0xf0]  ;;  %v1254_v36 = vld [vmem:[%s1727_s20 + $0x34] sm:$0xf]  ;;  %v1077_v37 = vld [vmem:[%s1727_s20 + $0x38] sm:$0xf0] }
  0x42   : > { %v1076_v38 = vor.u32 %v1255_v35, %v1075_v34  ;;  %v1080_v39 = vor.u32 %v1254_v36, %v1077_v37  ;;  %v1083_v40 = vld [vmem:[%s1727_s20 + $0x40] sm:$0xf]  ;;  %v1257_v41 = vld [vmem:[%s1727_s20 + $0x44] sm:$0xf0]  ;;  %v1256_v42 = vld [vmem:[%s1727_s20 + $0x44] sm:$0xf]  ;;  %p1524_p10 = pnand %p1523_p2, %p1519_p8 }
  0x43   : > { %v1085_v43 = vld [vmem:[%s1727_s20 + $0x48] sm:$0xf0]  ;;  %v1084_v44 = vor.u32 %v1257_v41, %v1083_v40  ;;  %v1287_v46 = vld [vmem:[#allocation7 + $0x38] sm:$0xff]  ;;  %v1091_v47 = vld [vmem:[%s1727_s20 + $0x50] sm:$0xf] }
  0x44   : > { %498 = vmatpush.bf16.msra.mxu0 %v1268_v6  ;;  %v1088_v45 = vor.u32 %v1256_v42, %v1085_v43  ;;  %697 = vmatpush.bf16.msra.mxu2 %v1287_v46  ;;  %v1259_v48 = vld [vmem:[%s1727_s20 + $0x54] sm:$0xf0]  ;;  %v1258_v49 = vld [vmem:[%s1727_s20 + $0x54] sm:$0xf]  ;;  %v1093_v50 = vld [vmem:[%s1727_s20 + $0x58] sm:$0xf0] }
  0x45   : > { %547 = vmatpush.bf16.msra.mxu1 %v1276_v7  ;;  %v1092_v51 = vor.u32 %v1259_v48, %v1091_v47  ;;  %v1096_v52 = vor.u32 %v1258_v49, %v1093_v50  ;;  %v1286_v53 = vld [vmem:[#allocation7 + $0x30] sm:$0xff]  ;;  %v1285_v54 = vld [vmem:[#allocation7 + $0x28] sm:$0xff]  ;;  %v1284_v55 = vld [vmem:[#allocation7 + $0x20] sm:$0xff] }
  0x46   : > { %v1099_v56 = vld [vmem:[%s1727_s20 + $0x60] sm:$0xf]  ;;  %v1261_v57 = vld [vmem:[%s1727_s20 + $0x64] sm:$0xf0]  ;;  %v1260_v58 = vld [vmem:[%s1727_s20 + $0x64] sm:$0xf] }
  0x47   : > { %v1101_v59 = vld [vmem:[%s1727_s20 + $0x68] sm:$0xf0]  ;;  %v1283_v60 = vld [vmem:[#allocation7 + $0x18] sm:$0xff]  ;;  %v1100_v61 = vor.u32 %v1261_v57, %v1099_v56  ;;  %v1282_v63 = vld [vmem:[#allocation7 + $0x10] sm:$0xff] }
  0x48   : > { %499 = vmatpush.bf16.msra.mxu0 %v1267_v8  ;;  %698 = vmatpush.bf16.msra.mxu2 %v1286_v53  ;;  %v1104_v62 = vor.u32 %v1260_v58, %v1101_v59  ;;  %v1281_v0 = vld [vmem:[#allocation7 + $0x8] sm:$0xff]  ;;  %v1280_v1 = vld [vmem:[#allocation7] sm:$0xff]  ;;  %v1107_v2 = vld [vmem:[%s1727_s20 + $0x70] sm:$0xf] }
  0x49   : > { %548 = vmatpush.bf16.msra.mxu1 %v1275_v9  ;;  %v1263_v3 = vld [vmem:[%s1727_s20 + $0x74] sm:$0xf0]  ;;  %v1262_v4 = vld [vmem:[%s1727_s20 + $0x74] sm:$0xf]  ;;  %v1109_v5 = vld [vmem:[%s1727_s20 + $0x78] sm:$0xf0] }
  0x4a   : > { %v1108_v6 = vor.u32 %v1263_v3, %v1107_v2  ;;  %v1112_v7 = vor.u32 %v1262_v4, %v1109_v5  ;;  %v1293_v2 = vld [vmem:[#allocation8 + $0x28] sm:$0xff] }
  0x4c   : > { %500 = vmatpush.bf16.msra.mxu0 %v1266_v10  ;;  %699 = vmatpush.bf16.msra.mxu2 %v1285_v54 }
  0x4d   : > { %549 = vmatpush.bf16.msra.mxu1 %v1274_v11 }
  0x50   : > { %501 = vmatpush.bf16.msra.mxu0 %v1265_v12  ;;  %700 = vmatpush.bf16.msra.mxu2 %v1284_v55 }
  0x51   : > { %550 = vmatpush.bf16.msra.mxu1 %v1273_v13 }
  0x54   : > { %502 = vmatpush.bf16.msra.mxu0 %v1264_v14  ;;  %701 = vmatpush.bf16.msra.mxu2 %v1283_v60 }
  0x55   : > { %551 = vmatpush.bf16.msra.mxu1 %v1272_v15 }
  0x57   : > { %503 = vmatmul.bf16.vlgmr.msra.gmra.mxu0 %v1052_v20 }
  0x58   : > { %552 = vmatmul.bf16.vlgmr.msra.gmra.mxu1 %v1056_v21  ;;  %702 = vmatpush.bf16.msra.mxu2 %v1282_v63 }
  0x5c   : > { %703 = vmatpush.bf16.msra.mxu2 %v1281_v0 }
  0x60   : > { %704 = vmatpush.bf16.msra.mxu2 %v1280_v1  ;;  %v1294_v1 = vld [vmem:[#allocation8 + $0x30] sm:$0xff] }
  0x67   : > { %508 = vmatmul.bf16.gmra.mxu0 %v1060_v26 }
  0x68   : > { %557 = vmatmul.bf16.gmra.mxu1 %v1064_v27 }
  0x77   : > { %513 = vmatmul.bf16.gmra.mxu0 %v1068_v32 }
  0x78   : > { %562 = vmatmul.bf16.gmra.mxu1 %v1072_v33 }
  0x87   : > { %518 = vmatmul.bf16.gmra.mxu0 %v1076_v38 }
  0x88   : > { %567 = vmatmul.bf16.gmra.mxu1 %v1080_v39 }
  0x97   : > { %523 = vmatmul.bf16.gmra.mxu0 %v1084_v44 }
  0x98   : > { %572 = vmatmul.bf16.gmra.mxu1 %v1088_v45 }
  0xa7   : > { %528 = vmatmul.bf16.gmra.mxu0 %v1092_v51 }
  0xa8   : > { %577 = vmatmul.bf16.gmra.mxu1 %v1096_v52 }
  0xb7   : > { %533 = vmatmul.bf16.gmra.mxu0 %v1100_v61 }
  0xb8   : > { %582 = vmatmul.bf16.gmra.mxu1 %v1104_v62  ;;  %v1295_v62 = vld [vmem:[#allocation8 + $0x38] sm:$0xff] }
  0xb9   : > { %818 = vmatpush.bf16.msra.mxu3 %v1295_v62 }
  0xbd   : > { %819 = vmatpush.bf16.msra.mxu3 %v1294_v1 }
  0xc1   : > { %820 = vmatpush.bf16.msra.mxu3 %v1293_v2 }
  0xc7   : > { %538 = vmatmul.bf16.gmra.mxu0 %v1108_v6  ;;  %v1292_v6 = vld [vmem:[#allocation8 + $0x20] sm:$0xff] }
  0xc8   : > { %587 = vmatmul.bf16.gmra.mxu1 %v1112_v7  ;;  %821 = vmatpush.bf16.msra.mxu3 %v1292_v6 }
  0xd4   : > { %v504_v8 = vpop.f32.mrf.mxu0 }
  0xd5   : > { %v553_v9 = vpop.f32.mrf.mxu1 }
  0xd6   : > { %v1773_v10 = vadd.f32 %v553_v9, %v504_v8 }
  0xd8   : > { %v593_v14 = vmax.f32 %v1773_v10, 0.0 }
  0xdc   : > { %v506_v11 = vpop.f32.mrf.mxu0 }
  0xdd   : > { %v555_v12 = vpop.f32.mrf.mxu1 }
  0xde   : > { %v1775_v13 = vadd.f32 %v555_v12, %v506_v11  ;;  %v1291_v11 = vld [vmem:[#allocation8 + $0x18] sm:$0xff] }
  0xdf   : > { %822 = vmatpush.bf16.msra.mxu3 %v1291_v11 }
  0xe0   : > { %v594_v15 = vmax.f32 %v1775_v13, 0.0 }
  0xe2   : > { %v641_v16 = vpack.c.bf16 %v594_v15, %v593_v14 }
  0xe4   : > { %705 = vmatmul.bf16.vlgmr.msra.gmra.mxu2 %v641_v16  ;;  %v509_v17 = vpop.f32.mrf.mxu0 }
  0xe5   : > { %v558_v18 = vpop.f32.mrf.mxu1 }
  0xe6   : > { %v1783_v19 = vadd.f32 %v558_v18, %v509_v17  ;;  %v1290_v18 = vld [vmem:[#allocation8 + $0x10] sm:$0xff] }
  0xe7   : > { %823 = vmatpush.bf16.msra.mxu3 %v1290_v18 }
  0xe8   : > { %v595_v23 = vmax.f32 %v1783_v19, 0.0 }
  0xec   : > { %v511_v20 = vpop.f32.mrf.mxu0 }
  0xed   : > { %v560_v21 = vpop.f32.mrf.mxu1 }
  0xee   : > { %v1785_v22 = vadd.f32 %v560_v21, %v511_v20  ;;  %v1289_v20 = vld [vmem:[#allocation8 + $0x8] sm:$0xff] }
  0xef   : > { %824 = vmatpush.bf16.msra.mxu3 %v1289_v20 }
  0xf0   : > { %v596_v24 = vmax.f32 %v1785_v22, 0.0 }
  0xf2   : > { %v642_v25 = vpack.c.bf16 %v596_v24, %v595_v23 }
  0xf4   : > { %710 = vmatmul.bf16.gmra.mxu2 %v642_v25  ;;  %v514_v26 = vpop.f32.mrf.mxu0 }
  0xf5   : > { %v563_v27 = vpop.f32.mrf.mxu1 }
  0xf6   : > { %v1793_v28 = vadd.f32 %v563_v27, %v514_v26 }
  0xf8   : > { %v597_v32 = vmax.f32 %v1793_v28, 0.0 }
  0xfc   : > { %v516_v29 = vpop.f32.mrf.mxu0 }
  0xfd   : > { %v565_v30 = vpop.f32.mrf.mxu1 }
  0xfe   : > { %v1795_v31 = vadd.f32 %v565_v30, %v516_v29  ;;  %v1288_v29 = vld [vmem:[#allocation8] sm:$0xff] }
  0xff   : > { %825 = vmatpush.bf16.msra.mxu3 %v1288_v29 }
 0x100   : > { %v598_v33 = vmax.f32 %v1795_v31, 0.0 }
 0x102   : > { %v643_v34 = vpack.c.bf16 %v598_v33, %v597_v32 }
 0x104   : > { %715 = vmatmul.bf16.gmra.mxu2 %v643_v34  ;;  %v519_v35 = vpop.f32.mrf.mxu0 }
 0x105   : > { %v568_v36 = vpop.f32.mrf.mxu1 }
 0x106   : > { %v1803_v37 = vadd.f32 %v568_v36, %v519_v35 }
 0x108   : > { %v599_v41 = vmax.f32 %v1803_v37, 0.0 }
 0x10c   : > { %v521_v38 = vpop.f32.mrf.mxu0 }
 0x10d   : > { %v570_v39 = vpop.f32.mrf.mxu1 }
 0x10e   : > { %v1805_v40 = vadd.f32 %v570_v39, %v521_v38 }
 0x110   : > { %v600_v42 = vmax.f32 %v1805_v40, 0.0 }
 0x112   : > { %v644_v43 = vpack.c.bf16 %v600_v42, %v599_v41 }
 0x114   : > { %720 = vmatmul.bf16.gmra.mxu2 %v644_v43  ;;  %v524_v44 = vpop.f32.mrf.mxu0 }
 0x115   : > { %v573_v45 = vpop.f32.mrf.mxu1 }
 0x116   : > { %v1813_v46 = vadd.f32 %v573_v45, %v524_v44 }
 0x118   : > { %v601_v50 = vmax.f32 %v1813_v46, 0.0 }
 0x11c   : > { %v526_v47 = vpop.f32.mrf.mxu0 }
 0x11d   : > { %v575_v48 = vpop.f32.mrf.mxu1 }
 0x11e   : > { %v1815_v49 = vadd.f32 %v575_v48, %v526_v47 }
 0x120   : > { %v602_v51 = vmax.f32 %v1815_v49, 0.0 }
 0x122   : > { %v645_v52 = vpack.c.bf16 %v602_v51, %v601_v50 }
 0x124   : > { %725 = vmatmul.bf16.gmra.mxu2 %v645_v52  ;;  %v529_v53 = vpop.f32.mrf.mxu0 }
 0x125   : > { %v578_v54 = vpop.f32.mrf.mxu1 }
 0x126   : > { %v1823_v55 = vadd.f32 %v578_v54, %v529_v53 }
 0x128   : > { %v603_v59 = vmax.f32 %v1823_v55, 0.0 }
 0x12c   : > { %v531_v56 = vpop.f32.mrf.mxu0 }
 0x12d   : > { %v580_v57 = vpop.f32.mrf.mxu1 }
 0x12e   : > { %v1825_v58 = vadd.f32 %v580_v57, %v531_v56 }
 0x130   : > { %v604_v60 = vmax.f32 %v1825_v58, 0.0 }
 0x132   : > { %v646_v61 = vpack.c.bf16 %v604_v60, %v603_v59 }
 0x134   : > { %730 = vmatmul.bf16.gmra.mxu2 %v646_v61  ;;  %v534_v63 = vpop.f32.mrf.mxu0 }
 0x135   : > { %v583_v0 = vpop.f32.mrf.mxu1 }
 0x136   : > { %v1833_v3 = vadd.f32 %v583_v0, %v534_v63 }
 0x138   : > { %v605_v8 = vmax.f32 %v1833_v3, 0.0 }
 0x13c   : > { %v536_v4 = vpop.f32.mrf.mxu0 }
 0x13d   : > { %v585_v5 = vpop.f32.mrf.mxu1 }
 0x13e   : > { %v1835_v7 = vadd.f32 %v585_v5, %v536_v4 }
 0x140   : > { %v606_v9 = vmax.f32 %v1835_v7, 0.0 }
 0x142   : > { %v647_v12 = vpack.c.bf16 %v606_v9, %v605_v8 }
 0x144   : > { %735 = vmatmul.bf16.gmra.mxu2 %v647_v12  ;;  %v539_v16 = vpop.f32.mrf.mxu0 }
 0x145   : > { %v588_v17 = vpop.f32.mrf.mxu1 }
 0x146   : > { %v1843_v21 = vadd.f32 %v588_v17, %v539_v16 }
 0x148   : > { %v607_v30 = vmax.f32 %v1843_v21, 0.0 }
 0x14c   : > { %v541_v25 = vpop.f32.mrf.mxu0 }
 0x14d   : > { %v590_v26 = vpop.f32.mrf.mxu1 }
 0x14e   : > { %v1845_v27 = vadd.f32 %v590_v26, %v541_v25 }
 0x150   : > { %v608_v34 = vmax.f32 %v1845_v27, 0.0 }
 0x152   : > { %v648_v35 = vpack.c.bf16 %v608_v34, %v607_v30 }
 0x154   : > { %740 = vmatmul.bf16.gmra.mxu2 %v648_v35 }
 0x167   : > { %v706_v36 = vpop.f32.mrf.mxu2 }
 0x168   : > { %v746_v39 = vmax.f32 %v706_v36, 0.0 }
 0x16f   : > { %v708_v38 = vpop.f32.mrf.mxu2 }
 0x170   : > { %v747_v43 = vmax.f32 %v708_v38, 0.0 }
 0x172   : > { %v762_v44 = vpack.c.bf16 %v747_v43, %v746_v39 }
 0x174   : > { %826 = vmatmul.bf16.vlgmr.msra.gmra.mxu3 %v762_v44 }
 0x177   : > { %v711_v45 = vpop.f32.mrf.mxu2 }
 0x178   : > { %v748_v48 = vmax.f32 %v711_v45, 0.0 }
 0x17f   : > { %v713_v47 = vpop.f32.mrf.mxu2 }
 0x180   : > { %v749_v52 = vmax.f32 %v713_v47, 0.0 }
 0x182   : > { %v763_v53 = vpack.c.bf16 %v749_v52, %v748_v48 }
 0x184   : > { %831 = vmatmul.bf16.gmra.mxu3 %v763_v53 }
 0x187   : > { %v716_v54 = vpop.f32.mrf.mxu2 }
 0x188   : > { %v750_v57 = vmax.f32 %v716_v54, 0.0 }
 0x18f   : > { %v718_v56 = vpop.f32.mrf.mxu2 }
 0x190   : > { %v751_v61 = vmax.f32 %v718_v56, 0.0 }
 0x192   : > { %v764_v62 = vpack.c.bf16 %v751_v61, %v750_v57 }
 0x194   : > { %836 = vmatmul.bf16.gmra.mxu3 %v764_v62 }
 0x197   : > { %v721_v63 = vpop.f32.mrf.mxu2 }
 0x198   : > { %v752_v1 = vmax.f32 %v721_v63, 0.0 }
 0x19f   : > { %v723_v0 = vpop.f32.mrf.mxu2 }
 0x1a0   : > { %v753_v2 = vmax.f32 %v723_v0, 0.0 }
 0x1a2   : > { %v765_v4 = vpack.c.bf16 %v753_v2, %v752_v1 }
 0x1a4   : > { %841 = vmatmul.bf16.gmra.mxu3 %v765_v4 }
 0x1a7   : > { %v726_v5 = vpop.f32.mrf.mxu2 }
 0x1a8   : > { %v754_v11 = vmax.f32 %v726_v5, 0.0 }
 0x1af   : > { %v728_v6 = vpop.f32.mrf.mxu2 }
 0x1b0   : > { %v755_v12 = vmax.f32 %v728_v6, 0.0 }
 0x1b2   : > { %v766_v16 = vpack.c.bf16 %v755_v12, %v754_v11 }
 0x1b4   : > { %846 = vmatmul.bf16.gmra.mxu3 %v766_v16 }
 0x1b7   : > { %v731_v17 = vpop.f32.mrf.mxu2 }
 0x1b8   : > { %v756_v20 = vmax.f32 %v731_v17, 0.0 }
 0x1bf   : > { %v733_v18 = vpop.f32.mrf.mxu2 }
 0x1c0   : > { %v757_v25 = vmax.f32 %v733_v18, 0.0 }
 0x1c2   : > { %v767_v26 = vpack.c.bf16 %v757_v25, %v756_v20 }
 0x1c4   : > { %851 = vmatmul.bf16.gmra.mxu3 %v767_v26 }
 0x1c7   : > { %v736_v29 = vpop.f32.mrf.mxu2 }
 0x1c8   : > { %v758_v36 = vmax.f32 %v736_v29, 0.0 }
 0x1cf   : > { %v738_v35 = vpop.f32.mrf.mxu2 }
 0x1d0   : > { %v759_v38 = vmax.f32 %v738_v35, 0.0 }
 0x1d2   : > { %v768_v39 = vpack.c.bf16 %v759_v38, %v758_v36 }
 0x1d4   : > { %856 = vmatmul.bf16.gmra.mxu3 %v768_v39 }
 0x1d7   : > { %v741_v43 = vpop.f32.mrf.mxu2 }
 0x1d8   : > { %v760_v45 = vmax.f32 %v741_v43, 0.0 }
 0x1df   : > { %v743_v44 = vpop.f32.mrf.mxu2 }
 0x1e0   : > { %v761_v47 = vmax.f32 %v743_v44, 0.0 }
 0x1e2   : > { %v769_v48 = vpack.c.bf16 %v761_v47, %v760_v45 }
 0x1e4   : > { %861 = vmatmul.bf16.gmra.mxu3 %v769_v48 }
 0x1f7   : > { %v827_v52 = vpop.f32.mrf.mxu3 }
 0x1f8   : > { %v867_v53 = vmax.f32 %v827_v52, 0.0 }
 0x1fa   : > { %v883_v54 = vadd.f32 %v867_v53, %v593_v14 }
 0x1fc   : > { %899 = vst [vmem:[%s1857_s21] sm:$0xff] %v883_v54 }
 0x1ff   : > { %v829_v56 = vpop.f32.mrf.mxu3 }
 0x200   : > { %v868_v57 = vmax.f32 %v829_v56, 0.0 }
 0x202   : > { %v884_v61 = vadd.f32 %v868_v57, %v594_v15 }
 0x204   : > { %900 = vst [vmem:[%s1857_s21 + $0x8] sm:$0xff] %v884_v61 }
 0x207   : > { %v832_v62 = vpop.f32.mrf.mxu3 }
 0x208   : > { %v869_v63 = vmax.f32 %v832_v62, 0.0 }
 0x20a   : > { %v885_v10 = vadd.f32 %v869_v63, %v595_v23 }
 0x20c   : > { %901 = vst [vmem:[%s1857_s21 + $0x10] sm:$0xff] %v885_v10 }
 0x20f   : > { %v834_v14 = vpop.f32.mrf.mxu3 }
 0x210   : > { %v870_v0 = vmax.f32 %v834_v14, 0.0 }
 0x212   : > { %v886_v1 = vadd.f32 %v870_v0, %v596_v24 }
 0x214   : > { %902 = vst [vmem:[%s1857_s21 + $0x18] sm:$0xff] %v886_v1 }
 0x217   : > { %v837_v2 = vpop.f32.mrf.mxu3 }
 0x218   : > { %v871_v4 = vmax.f32 %v837_v2, 0.0 }
 0x21a   : > { %v887_v13 = vadd.f32 %v871_v4, %v597_v32 }
 0x21c   : > { %903 = vst [vmem:[%s1857_s21 + $0x20] sm:$0xff] %v887_v13 }
 0x21f   : > { %v839_v15 = vpop.f32.mrf.mxu3 }
 0x220   : > { %v872_v5 = vmax.f32 %v839_v15, 0.0 }
 0x222   : > { %v888_v19 = vadd.f32 %v872_v5, %v598_v33 }
 0x224   : > { %904 = vst [vmem:[%s1857_s21 + $0x28] sm:$0xff] %v888_v19 }
 0x227   : > { %v842_v23 = vpop.f32.mrf.mxu3 }
 0x228   : > { %v873_v6 = vmax.f32 %v842_v23, 0.0 }
 0x22a   : > { %v889_v22 = vadd.f32 %v873_v6, %v599_v41 }
 0x22c   : > { %905 = vst [vmem:[%s1857_s21 + $0x30] sm:$0xff] %v889_v22 }
 0x22f   : > { %v844_v24 = vpop.f32.mrf.mxu3 }
 0x230   : > { %v874_v11 = vmax.f32 %v844_v24, 0.0 }
 0x232   : > { %v890_v28 = vadd.f32 %v874_v11, %v600_v42 }
 0x234   : > { %906 = vst [vmem:[%s1857_s21 + $0x38] sm:$0xff] %v890_v28 }
 0x237   : > { %v847_v32 = vpop.f32.mrf.mxu3 }
 0x238   : > { %v875_v12 = vmax.f32 %v847_v32, 0.0 }
 0x23a   : > { %v891_v31 = vadd.f32 %v875_v12, %v601_v50 }
 0x23c   : > { %907 = vst [vmem:[%s1857_s21 + $0x40] sm:$0xff] %v891_v31 }
 0x23f   : > { %v849_v33 = vpop.f32.mrf.mxu3 }
 0x240   : > { %v876_v16 = vmax.f32 %v849_v33, 0.0 }
 0x242   : > { %v892_v37 = vadd.f32 %v876_v16, %v602_v51 }
 0x244   : > { %908 = vst [vmem:[%s1857_s21 + $0x48] sm:$0xff] %v892_v37 }
 0x247   : > { %v852_v41 = vpop.f32.mrf.mxu3 }
 0x248   : > { %v877_v17 = vmax.f32 %v852_v41, 0.0 }
 0x24a   : > { %v893_v40 = vadd.f32 %v877_v17, %v603_v59 }
 0x24c   : > { %909 = vst [vmem:[%s1857_s21 + $0x50] sm:$0xff] %v893_v40 }
 0x24f   : > { %v854_v42 = vpop.f32.mrf.mxu3 }
 0x250   : > { %v878_v18 = vmax.f32 %v854_v42, 0.0 }
 0x252   : > { %v894_v46 = vadd.f32 %v878_v18, %v604_v60 }
 0x254   : > { %910 = vst [vmem:[%s1857_s21 + $0x58] sm:$0xff] %v894_v46 }
 0x257   : > { %v857_v50 = vpop.f32.mrf.mxu3 }
 0x258   : > { %v879_v49 = vmax.f32 %v857_v50, 0.0 }
 0x25a   : > { %v895_v51 = vadd.f32 %v879_v49, %v605_v8 }
 0x25c   : > { %911 = vst [vmem:[%s1857_s21 + $0x60] sm:$0xff] %v895_v51 }
 0x25f   : > { %v859_v20 = vpop.f32.mrf.mxu3 }
 0x260   : > { %v880_v25 = vmax.f32 %v859_v20, 0.0 }
 0x262   : > { %v896_v55 = vadd.f32 %v880_v25, %v606_v9 }
 0x264   : > { %912 = vst [vmem:[%s1857_s21 + $0x68] sm:$0xff] %v896_v55 }
 0x267   : > { %v862_v59 = vpop.f32.mrf.mxu3 }
 0x268   : > { %v881_v58 = vmax.f32 %v862_v59, 0.0 }
 0x26a   : > { %v897_v60 = vadd.f32 %v881_v58, %v607_v30 }
 0x26c   : > { %913 = vst [vmem:[%s1857_s21 + $0x70] sm:$0xff] %v897_v60 }
 0x26f   : > { %v864_v3 = vpop.f32.mrf.mxu3 }
 0x270   : > { %v882_v7 = vmax.f32 %v864_v3, 0.0 }
 0x272   : > { %v898_v8 = vadd.f32 %v882_v7, %v608_v34 }
 0x274   : > { %914 = vst [vmem:[%s1857_s21 + $0x78] sm:$0xff] %v898_v8 }
 0x275   : > { %1527 = shalt.err (!%p1524_p10)
}
 0x276   : > { %s1583_s8 = smov 128   ;;  %s1584_s14 = smov 8  }
 0x277   : > { %1311 = dma.vmem_to_hbm [thread:$0]  (%p1693_p7), %s929_s13, 2048, %s931_s24, %s916_s19, %s1583_s8, %s1583_s8, %s1584_s14  }
 0x278 PF: > { %s945_s20 = sand.u32 1, %s1562_s15   ;;  %p1950_p12 = scmp.ge.s32.totalorder %s1574_s18, 2 }
 0x279   : > { %s946_s21 = scalar_lea.sflag [#allocation4], %s945_s20 }
 0x27a   : > { %p1328_p13 = pnand %p1950_p12, %p1645_p6 }
 0x27c   : > { %p1329_p0 = pneg %p1328_p13 }
 0x27e   : > { %1557 = dma.done.wait (%p1329_p0), %s946_s21, 2048  }
 0x27f   : > { %1559 = vsyncadd (%p1329_p0), %s946_s21, 4294965248  ;;  %p19_p3 = scmp.ge.s32.totalorder %s1677_s23, 4   ;;  %s1951_s15 = smov %s1566_s16 }
 0x280   : > { %s1952_s16 = smov %s1570_s17  ;;  %s1953_s17 = smov %s1689_s27 }
 0x281   : > { %s1954_s18 = smov %s1677_s23  ;;  %21 = sbr.rel (!%p19_p3) target bundleno = 7 (0x7), region = 93 }
 0x286   :  { %952 = vsyncpa [#allocation3], 1 }
 0x287   :  { %954 = vsyncpa [#allocation3 + $0x1], 1 }
 0x288   :  { %955 = vsyncpa [#allocation6], 1 }
 0x289   :  { %956 = vsyncpa [#allocation9], 1 }
 0x28a   :  { %957 = vsyncpa [#allocation4], 1 }
 0x28b   :  { %959 = vsyncpa [#allocation4 + $0x1], 1 }

</bundles_post_ra>
